<compile_context>
chip_gen: v5e
topology: v5e:2x2
jax: 0.10.0
libtpu: 0.0.40
codegen_flags: <defaults>
</compile_context>

<pallas_src>
import functools

import jax
import jax.numpy as jnp
from jax.experimental import pallas as pl
from jax.experimental.pallas import tpu as pltpu

# ODE constants (from the module __init__) — no learnable parameters.
J0, k1, k2, k3, k4, k5, k6 = 2.5, 100.0, 6.0, 16.0, 100.0, 1.28, 12.0
k, kappa, q, K1, psi, N, A = 1.8, 13.0, 4.0, 0.52, 0.1, 1.0, 4.0

_LANE = 128              # lane width (fast axis)
_SPECIES = 7
_MAX_BLOCK_ROWS = 1024   # rows/block: 7*1024*128*4 B = 3.5 MiB per buffer
_SPLIT_ROWS = 512        # if R > 512 rows (>64K lanes) force >= 2 grid steps
_MAX_RK4_BLOCK_ROWS = 256  # smaller blocks: RK4 keeps ~6 state-sized temps live
_APPROX_RECIP = False    # True -> EUP vrcp (lower precision, free slot)

_INV_K1 = 1.0 / K1       # folded at trace time


def _round_up(x, m):
    return ((x + m - 1) // m) * m


def _cdiv(a, b):
    return -(-a // b)


# --------------------------------------------------------------------------
# RHS math on per-species (rows, 128) slabs (shared by both kernels)
# --------------------------------------------------------------------------

def _species_rhs(S1, S2, S3, S4, S5, S6, S7):
    # Hill-type denominator: 1 + (S6/K1)**q with q = 4.0
    r = S6 * _INV_K1
    r2 = r * r
    denom = 1.0 + r2 * r2
    inv = pl.reciprocal(denom, approx=_APPROX_RECIP)

    v1 = k1 * S1 * S6 * inv              # phosphofructokinase flux
    v2 = k2 * S2 * (N - S5)
    v3 = k3 * S3 * (A - S6)
    v4 = k4 * S4 * S5
    v6 = k6 * S2 * S5
    vtr = kappa * (S4 - S7)

    dS1 = J0 - v1
    dS2 = 2.0 * v1 - v2 - v6
    dS3 = v2 - v3
    dS4 = v3 - v4 - vtr
    dS5 = v2 - v4 - v6
    dS6 = -2.0 * v1 + 2.0 * v3 - k5 * S6
    dS7 = psi * vtr - k * S7
    return dS1, dS2, dS3, dS4, dS5, dS6, dS7


def _rhs_stacked(y):
    """y: (7, rows, 128) value -> (7, rows, 128) derivative value."""
    d = _species_rhs(*(y[i] for i in range(_SPECIES)))
    return jnp.stack(d, axis=0)


# --------------------------------------------------------------------------
# Kernels
# --------------------------------------------------------------------------

def _glycolysis_kernel(y_ref, o_ref):
    # y_ref / o_ref: (7, block_rows, 128); each species is a dense slab.
    d = _species_rhs(*(y_ref[i] for i in range(_SPECIES)))
    for i in range(_SPECIES):
        o_ref[i] = d[i]                  # unmasked, lane-dense stores


def _rk4_kernel(dt_ref, y_ref, o_ref, *, n_steps):
    # Fused classical RK4 integrator: n_steps * 4 RHS evals with the state
    # resident in VMEM/vregs -- one HBM round trip for the whole call.
    dt = dt_ref[0]
    y0 = y_ref[...]

    def step(_, y):
        f1 = _rhs_stacked(y)
        f2 = _rhs_stacked(y + (0.5 * dt) * f1)
        f3 = _rhs_stacked(y + (0.5 * dt) * f2)
        f4 = _rhs_stacked(y + dt * f3)
        return y + (dt * (1.0 / 6.0)) * (f1 + 2.0 * f2 + 2.0 * f3 + f4)

    o_ref[...] = jax.lax.fori_loop(0, n_steps, step, y0)


# --------------------------------------------------------------------------
# Block planning (shared between padding and pallas_call)
# --------------------------------------------------------------------------

def _plan_rows(rows_needed):
    """-> (R, block_rows, n_blocks); R = block_rows * n_blocks, all mult of 8."""
    r = max(8, _round_up(rows_needed, 8))
    n_blocks = _cdiv(r, _MAX_BLOCK_ROWS)
    if r > _SPLIT_ROWS:                  # keep both v7x TensorCores busy
        n_blocks = max(n_blocks, 2)
    block_rows = _round_up(_cdiv(r, n_blocks), 8)
    return block_rows * n_blocks, block_rows, n_blocks


def _block_rows_for(R, max_block_rows=_MAX_BLOCK_ROWS):
    """Largest planned block that exactly divides R (no partial last block)."""
    _, br, _ = _plan_rows(R)
    br = min(br, R, max_block_rows)
    while R % br:
        br -= 8
    return br


# --------------------------------------------------------------------------
# pallas_call wrappers
# --------------------------------------------------------------------------

def _pallas_rhs(yp):
    """Core pallas_call on planar state.  yp: (7, R, 128) f32, R % 8 == 0."""
    assert yp.ndim == 3 and yp.shape[0] == _SPECIES and yp.shape[2] == _LANE
    R = yp.shape[1]
    assert R % 8 == 0
    block_rows = _block_rows_for(R)
    grid = (R // block_rows,)

    cost = pl.CostEstimate(
        flops=40 * R * _LANE,
        transcendentals=0,
        bytes_accessed=2 * _SPECIES * R * _LANE * 4,
    )
    return pl.pallas_call(
        _glycolysis_kernel,
        out_shape=jax.ShapeDtypeStruct((_SPECIES, R, _LANE), jnp.float32),
        grid=grid,
        in_specs=[pl.BlockSpec((_SPECIES, block_rows, _LANE),
                               lambda i: (0, i, 0))],
        out_specs=pl.BlockSpec((_SPECIES, block_rows, _LANE),
                               lambda i: (0, i, 0)),
        compiler_params=pltpu.CompilerParams(
            dimension_semantics=("parallel",)),
        cost_estimate=cost,
    )(yp)


def glycolysis_rk4_planar(yp, dt, n_steps):
    """Fused RK4 integrator on resident planar state: n_steps steps, one call."""
    assert yp.ndim == 3 and yp.shape[0] == _SPECIES and yp.shape[2] == _LANE
    R = yp.shape[1]
    assert R % 8 == 0
    block_rows = _block_rows_for(R, _MAX_RK4_BLOCK_ROWS)
    grid = (R // block_rows,)
    dt_arr = jnp.asarray([dt], dtype=jnp.float32)

    return pl.pallas_call(
        functools.partial(_rk4_kernel, n_steps=int(n_steps)),
        out_shape=jax.ShapeDtypeStruct(yp.shape, jnp.float32),
        grid=grid,
        in_specs=[pl.BlockSpec(memory_space=pltpu.MemorySpace.SMEM),
                  pl.BlockSpec((_SPECIES, block_rows, _LANE),
                               lambda i: (0, i, 0))],
        out_specs=pl.BlockSpec((_SPECIES, block_rows, _LANE),
                               lambda i: (0, i, 0)),
        compiler_params=pltpu.CompilerParams(
            dimension_semantics=("parallel",)),
    )(dt_arr, yp)


# ----- zero-copy hot path: keep state in planar (7, R, 128) layout ---------

def to_planar(y):
    """(B*7,) or (B,7) PyTorch-layout state -> ((7, R, 128) planar state, B)."""
    y2 = jnp.asarray(y, dtype=jnp.float32).reshape(-1, _SPECIES)
    B = y2.shape[0]
    R, _, _ = _plan_rows(_cdiv(max(B, 1), _LANE))
    Bp = R * _LANE
    yt = jnp.zeros((_SPECIES, Bp), jnp.float32).at[:, :B].set(y2.T)
    return yt.reshape(_SPECIES, R, _LANE), B


def from_planar(yp, B):
    """(7, R, 128) planar values -> (B, 7) PyTorch convention."""
    R = yp.shape[1]
    return yp.reshape(_SPECIES, R * _LANE)[:, :B].T


def glycolysis_rhs_planar(t, yp):
    """RHS on resident planar state; no pad / transpose per call."""
    del t
    return _pallas_rhs(yp)


# ----- PyTorch-convention wrapper: glycolysis.forward(t, y) ----------------

def glycolysis_forward(t, y):
    """Matches glycolysis.forward(t, y): y.view(-1, 7) -> (B, 7) derivatives."""
    del t  # unused, same as the PyTorch module
    yp, B = to_planar(y)
    return from_planar(_pallas_rhs(yp), B)


# ----- pure-JAX references (sanity checks) ----------------------------------

def _reference(y):
    y2 = jnp.asarray(y, dtype=jnp.float32).reshape(-1, _SPECIES)
    S1, S2, S3, S4, S5, S6, S7 = [y2[:, i] for i in range(_SPECIES)]
    denom = 1.0 + (S6 / K1) ** q
    dS1 = J0 - k1 * S1 * S6 / denom
    dS2 = 2.0 * (k1 * S1 * S6) / denom - k2 * S2 * (N - S5) - k6 * S2 * S5
    dS3 = k2 * S2 * (N - S5) - k3 * S3 * (A - S6)
    dS4 = k3 * S3 * (A - S6) - k4 * S4 * S5 - kappa * (S4 - S7)
    dS5 = k2 * S2 * (N - S5) - k4 * S4 * S5 - k6 * S2 * S5
    dS6 = -2.0 * (k1 * S1 * S6) / denom + 2.0 * k3 * S3 * (A - S6) - k5 * S6
    dS7 = psi * kappa * (S4 - S7) - k * S7
    return jnp.stack([dS1, dS2, dS3, dS4, dS5, dS6, dS7], axis=1)


def _reference_rk4(y2, dt, n_steps):
    ys = jnp.asarray(y2, jnp.float32)
    for _ in range(n_steps):
        f1 = _reference(ys)
        f2 = _reference(ys + 0.5 * dt * f1)
        f3 = _reference(ys + 0.5 * dt * f2)
        f4 = _reference(ys + dt * f3)
        ys = ys + (dt / 6.0) * (f1 + 2.0 * f2 + 2.0 * f3 + f4)
    return ys


if __name__ == "__main__":
    key = jax.random.PRNGKey(0)
    B = 8  # small batch of state vectors
    # positive, physically plausible concentrations
    y = jax.random.uniform(key, (B * 7,), dtype=jnp.float32,
                           minval=0.1, maxval=2.0)
    t = jnp.float32(0.0)

    ref = _reference(y)

    # PyTorch-convention path
    out = jax.block_until_ready(glycolysis_forward(t, y))
    assert out.shape == (B, 7)
    assert jnp.allclose(out, ref, rtol=1e-5, atol=1e-4)

    # zero-copy planar path (what an ODE solver should use in its hot loop)
    yp, Bn = to_planar(y)
    dyp = jax.block_until_ready(glycolysis_rhs_planar(t, yp))
    out2 = from_planar(dyp, Bn)
    assert jnp.allclose(out2, ref, rtol=1e-5, atol=1e-4)

    # fused RK4 integrator: many RHS evals in a single pallas_call
    dt, n_steps = 1e-3, 8
    yp_out = jax.block_until_ready(glycolysis_rk4_planar(yp, dt, n_steps))
    y_out = from_planar(yp_out, Bn)
    y_ref_state = _reference_rk4(y.reshape(-1, 7), dt, n_steps)
    assert jnp.allclose(y_out, y_ref_state, rtol=1e-3, atol=1e-4)

    print("KERNEL_OK")
</pallas_src>

<mosaic_0001>
module attributes {stable_mosaic.version = 11 : i64} {
  func.func @_glycolysis_kernel(%arg0: i32, %arg1: memref<7x8x128xf32, #tpu.memory_space<vmem>>, %arg2: memref<7x8x128xf32, #tpu.memory_space<vmem>>) attributes {dimension_semantics = [#tpu.dimension_semantics<parallel>], iteration_bounds = array<i64: 1>, scalar_prefetch = 0 : i64, scratch_operands = 0 : i64, tpu.core_type = #tpu.core_type<tc>, window_params = [{transform_indices = @transform_0, window_bounds = array<i64: 7, 8, 128>}, {transform_indices = @transform_1, window_bounds = array<i64: 7, 8, 128>}]} {
    %c0 = arith.constant 0 : index
    %c0_0 = arith.constant 0 : index
    %c0_1 = arith.constant 0 : index
    %0 = vector.load %arg1[%c0, %c0_0, %c0_1] : memref<7x8x128xf32, #tpu.memory_space<vmem>>, vector<1x8x128xf32>
    %1 = vector.shape_cast %0 : vector<1x8x128xf32> to vector<8x128xf32>
    %c1 = arith.constant 1 : index
    %c0_2 = arith.constant 0 : index
    %c0_3 = arith.constant 0 : index
    %2 = vector.load %arg1[%c1, %c0_2, %c0_3] : memref<7x8x128xf32, #tpu.memory_space<vmem>>, vector<1x8x128xf32>
    %3 = vector.shape_cast %2 : vector<1x8x128xf32> to vector<8x128xf32>
    %c2 = arith.constant 2 : index
    %c0_4 = arith.constant 0 : index
    %c0_5 = arith.constant 0 : index
    %4 = vector.load %arg1[%c2, %c0_4, %c0_5] : memref<7x8x128xf32, #tpu.memory_space<vmem>>, vector<1x8x128xf32>
    %5 = vector.shape_cast %4 : vector<1x8x128xf32> to vector<8x128xf32>
    %c3 = arith.constant 3 : index
    %c0_6 = arith.constant 0 : index
    %c0_7 = arith.constant 0 : index
    %6 = vector.load %arg1[%c3, %c0_6, %c0_7] : memref<7x8x128xf32, #tpu.memory_space<vmem>>, vector<1x8x128xf32>
    %7 = vector.shape_cast %6 : vector<1x8x128xf32> to vector<8x128xf32>
    %c4 = arith.constant 4 : index
    %c0_8 = arith.constant 0 : index
    %c0_9 = arith.constant 0 : index
    %8 = vector.load %arg1[%c4, %c0_8, %c0_9] : memref<7x8x128xf32, #tpu.memory_space<vmem>>, vector<1x8x128xf32>
    %9 = vector.shape_cast %8 : vector<1x8x128xf32> to vector<8x128xf32>
    %c5 = arith.constant 5 : index
    %c0_10 = arith.constant 0 : index
    %c0_11 = arith.constant 0 : index
    %10 = vector.load %arg1[%c5, %c0_10, %c0_11] : memref<7x8x128xf32, #tpu.memory_space<vmem>>, vector<1x8x128xf32>
    %11 = vector.shape_cast %10 : vector<1x8x128xf32> to vector<8x128xf32>
    %c6 = arith.constant 6 : index
    %c0_12 = arith.constant 0 : index
    %c0_13 = arith.constant 0 : index
    %12 = vector.load %arg1[%c6, %c0_12, %c0_13] : memref<7x8x128xf32, #tpu.memory_space<vmem>>, vector<1x8x128xf32>
    %13 = vector.shape_cast %12 : vector<1x8x128xf32> to vector<8x128xf32>
    %cst = arith.constant 1.92307687 : f32
    %14 = vector.broadcast %cst : f32 to vector<8x128xf32>
    %15 = arith.mulf %11, %14 : vector<8x128xf32>
    %16 = arith.mulf %15, %15 : vector<8x128xf32>
    %17 = arith.mulf %16, %16 : vector<8x128xf32>
    %cst_14 = arith.constant 1.000000e+00 : f32
    %18 = vector.broadcast %cst_14 : f32 to vector<8x128xf32>
    %19 = arith.addf %18, %17 : vector<8x128xf32>
    %20 = tpu.reciprocal %19 : vector<8x128xf32> -> vector<8x128xf32>
    %cst_15 = arith.constant 1.000000e+02 : f32
    %21 = vector.broadcast %cst_15 : f32 to vector<8x128xf32>
    %22 = arith.mulf %21, %1 : vector<8x128xf32>
    %23 = arith.mulf %22, %11 : vector<8x128xf32>
    %24 = arith.mulf %23, %20 : vector<8x128xf32>
    %cst_16 = arith.constant 6.000000e+00 : f32
    %25 = vector.broadcast %cst_16 : f32 to vector<8x128xf32>
    %26 = arith.mulf %25, %3 : vector<8x128xf32>
    %cst_17 = arith.constant 1.000000e+00 : f32
    %27 = vector.broadcast %cst_17 : f32 to vector<8x128xf32>
    %28 = arith.subf %27, %9 : vector<8x128xf32>
    %29 = arith.mulf %26, %28 : vector<8x128xf32>
    %cst_18 = arith.constant 1.600000e+01 : f32
    %30 = vector.broadcast %cst_18 : f32 to vector<8x128xf32>
    %31 = arith.mulf %30, %5 : vector<8x128xf32>
    %cst_19 = arith.constant 4.000000e+00 : f32
    %32 = vector.broadcast %cst_19 : f32 to vector<8x128xf32>
    %33 = arith.subf %32, %11 : vector<8x128xf32>
    %34 = arith.mulf %31, %33 : vector<8x128xf32>
    %cst_20 = arith.constant 1.000000e+02 : f32
    %35 = vector.broadcast %cst_20 : f32 to vector<8x128xf32>
    %36 = arith.mulf %35, %7 : vector<8x128xf32>
    %37 = arith.mulf %36, %9 : vector<8x128xf32>
    %cst_21 = arith.constant 1.200000e+01 : f32
    %38 = vector.broadcast %cst_21 : f32 to vector<8x128xf32>
    %39 = arith.mulf %38, %3 : vector<8x128xf32>
    %40 = arith.mulf %39, %9 : vector<8x128xf32>
    %41 = arith.subf %7, %13 : vector<8x128xf32>
    %cst_22 = arith.constant 1.300000e+01 : f32
    %42 = vector.broadcast %cst_22 : f32 to vector<8x128xf32>
    %43 = arith.mulf %42, %41 : vector<8x128xf32>
    %cst_23 = arith.constant 2.500000e+00 : f32
    %44 = vector.broadcast %cst_23 : f32 to vector<8x128xf32>
    %45 = arith.subf %44, %24 : vector<8x128xf32>
    %cst_24 = arith.constant 2.000000e+00 : f32
    %46 = vector.broadcast %cst_24 : f32 to vector<8x128xf32>
    %47 = arith.mulf %46, %24 : vector<8x128xf32>
    %48 = arith.subf %47, %29 : vector<8x128xf32>
    %49 = arith.subf %48, %40 : vector<8x128xf32>
    %50 = arith.subf %29, %34 : vector<8x128xf32>
    %51 = arith.subf %34, %37 : vector<8x128xf32>
    %52 = arith.subf %51, %43 : vector<8x128xf32>
    %53 = arith.subf %29, %37 : vector<8x128xf32>
    %54 = arith.subf %53, %40 : vector<8x128xf32>
    %cst_25 = arith.constant -2.000000e+00 : f32
    %55 = vector.broadcast %cst_25 : f32 to vector<8x128xf32>
    %56 = arith.mulf %55, %24 : vector<8x128xf32>
    %cst_26 = arith.constant 2.000000e+00 : f32
    %57 = vector.broadcast %cst_26 : f32 to vector<8x128xf32>
    %58 = arith.mulf %57, %34 : vector<8x128xf32>
    %59 = arith.addf %56, %58 : vector<8x128xf32>
    %cst_27 = arith.constant 1.280000e+00 : f32
    %60 = vector.broadcast %cst_27 : f32 to vector<8x128xf32>
    %61 = arith.mulf %60, %11 : vector<8x128xf32>
    %62 = arith.subf %59, %61 : vector<8x128xf32>
    %cst_28 = arith.constant 1.000000e-01 : f32
    %63 = vector.broadcast %cst_28 : f32 to vector<8x128xf32>
    %64 = arith.mulf %63, %43 : vector<8x128xf32>
    %cst_29 = arith.constant 1.800000e+00 : f32
    %65 = vector.broadcast %cst_29 : f32 to vector<8x128xf32>
    %66 = arith.mulf %65, %13 : vector<8x128xf32>
    %67 = arith.subf %64, %66 : vector<8x128xf32>
    %c0_30 = arith.constant 0 : index
    %c0_31 = arith.constant 0 : index
    %c0_32 = arith.constant 0 : index
    %68 = vector.load %arg2[%c0_30, %c0_31, %c0_32] : memref<7x8x128xf32, #tpu.memory_space<vmem>>, vector<1x8x128xf32>
    %69 = vector.shape_cast %68 : vector<1x8x128xf32> to vector<8x128xf32>
    %70 = vector.shape_cast %45 : vector<8x128xf32> to vector<1x8x128xf32>
    tpu.vector_store %arg2[%c0_30, %c0_31, %c0_32], %70 {strides = array<i32>} : memref<7x8x128xf32, #tpu.memory_space<vmem>>, vector<1x8x128xf32>,
    %c1_33 = arith.constant 1 : index
    %c0_34 = arith.constant 0 : index
    %c0_35 = arith.constant 0 : index
    %71 = vector.load %arg2[%c1_33, %c0_34, %c0_35] : memref<7x8x128xf32, #tpu.memory_space<vmem>>, vector<1x8x128xf32>
    %72 = vector.shape_cast %71 : vector<1x8x128xf32> to vector<8x128xf32>
    %73 = vector.shape_cast %49 : vector<8x128xf32> to vector<1x8x128xf32>
    tpu.vector_store %arg2[%c1_33, %c0_34, %c0_35], %73 {strides = array<i32>} : memref<7x8x128xf32, #tpu.memory_space<vmem>>, vector<1x8x128xf32>,
    %c2_36 = arith.constant 2 : index
    %c0_37 = arith.constant 0 : index
    %c0_38 = arith.constant 0 : index
    %74 = vector.load %arg2[%c2_36, %c0_37, %c0_38] : memref<7x8x128xf32, #tpu.memory_space<vmem>>, vector<1x8x128xf32>
    %75 = vector.shape_cast %74 : vector<1x8x128xf32> to vector<8x128xf32>
    %76 = vector.shape_cast %50 : vector<8x128xf32> to vector<1x8x128xf32>
    tpu.vector_store %arg2[%c2_36, %c0_37, %c0_38], %76 {strides = array<i32>} : memref<7x8x128xf32, #tpu.memory_space<vmem>>, vector<1x8x128xf32>,
    %c3_39 = arith.constant 3 : index
    %c0_40 = arith.constant 0 : index
    %c0_41 = arith.constant 0 : index
    %77 = vector.load %arg2[%c3_39, %c0_40, %c0_41] : memref<7x8x128xf32, #tpu.memory_space<vmem>>, vector<1x8x128xf32>
    %78 = vector.shape_cast %77 : vector<1x8x128xf32> to vector<8x128xf32>
    %79 = vector.shape_cast %52 : vector<8x128xf32> to vector<1x8x128xf32>
    tpu.vector_store %arg2[%c3_39, %c0_40, %c0_41], %79 {strides = array<i32>} : memref<7x8x128xf32, #tpu.memory_space<vmem>>, vector<1x8x128xf32>,
    %c4_42 = arith.constant 4 : index
    %c0_43 = arith.constant 0 : index
    %c0_44 = arith.constant 0 : index
    %80 = vector.load %arg2[%c4_42, %c0_43, %c0_44] : memref<7x8x128xf32, #tpu.memory_space<vmem>>, vector<1x8x128xf32>
    %81 = vector.shape_cast %80 : vector<1x8x128xf32> to vector<8x128xf32>
    %82 = vector.shape_cast %54 : vector<8x128xf32> to vector<1x8x128xf32>
    tpu.vector_store %arg2[%c4_42, %c0_43, %c0_44], %82 {strides = array<i32>} : memref<7x8x128xf32, #tpu.memory_space<vmem>>, vector<1x8x128xf32>,
    %c5_45 = arith.constant 5 : index
    %c0_46 = arith.constant 0 : index
    %c0_47 = arith.constant 0 : index
    %83 = vector.load %arg2[%c5_45, %c0_46, %c0_47] : memref<7x8x128xf32, #tpu.memory_space<vmem>>, vector<1x8x128xf32>
    %84 = vector.shape_cast %83 : vector<1x8x128xf32> to vector<8x128xf32>
    %85 = vector.shape_cast %62 : vector<8x128xf32> to vector<1x8x128xf32>
    tpu.vector_store %arg2[%c5_45, %c0_46, %c0_47], %85 {strides = array<i32>} : memref<7x8x128xf32, #tpu.memory_space<vmem>>, vector<1x8x128xf32>,
    %c6_48 = arith.constant 6 : index
    %c0_49 = arith.constant 0 : index
    %c0_50 = arith.constant 0 : index
    %86 = vector.load %arg2[%c6_48, %c0_49, %c0_50] : memref<7x8x128xf32, #tpu.memory_space<vmem>>, vector<1x8x128xf32>
    %87 = vector.shape_cast %86 : vector<1x8x128xf32> to vector<8x128xf32>
    %88 = vector.shape_cast %67 : vector<8x128xf32> to vector<1x8x128xf32>
    tpu.vector_store %arg2[%c6_48, %c0_49, %c0_50], %88 {strides = array<i32>} : memref<7x8x128xf32, #tpu.memory_space<vmem>>, vector<1x8x128xf32>,
    return
  }
  func.func @transform_0(%arg0: i32) -> (i32, i32, i32) {
    %c0_i32 = arith.constant 0 : i32
    %c0_i32_0 = arith.constant 0 : i32
    %c0_i32_1 = arith.constant 0 : i32
    return %c0_i32, %arg0, %c0_i32_0 : i32, i32, i32
  }
  func.func @transform_1(%arg0: i32) -> (i32, i32, i32) {
    %c0_i32 = arith.constant 0 : i32
    %c0_i32_0 = arith.constant 0 : i32
    %c0_i32_1 = arith.constant 0 : i32
    return %c0_i32, %arg0, %c0_i32_0 : i32, i32, i32
  }
}

</mosaic_0001>

<bundles_post_ra>
// kernel: tpu_custom_call.1
= control target key start
LH: loop header
LB: loop body
LE: loop exit
PB: predicated region body
PF: predicated region fallthrough
CT: control target
= control target key end

     0   :  { %6 = vsyncpa [#allocation3], 0  ;;  %s204_s0 = inlined_call_operand.hbm [shape: f32[7,8,128], index: 0, kind: input, shape index: {}]   ;;  %s205_s1 = inlined_call_operand.hbm [shape: f32[7,8,128], index: 1, kind: output, shape index: {}]  }
   0x1   :  { %7 = vsyncpa [#allocation4], 0  ;;  %s12_s8 = sshll.u32 %s204_s0, 4  ;;  %s178_s9 = smov [#allocation2]   ;;  %s13_s8 = int_to_ptr.hbm [resolvable:$true] %s12_s8 }
   0x2   :  { %s14_s10 = sshll.u32 %s178_s9, 4  ;;  %s179_s11 = smov 128   ;;  %s15_s10 = int_to_ptr.vmem [resolvable:$true] %s14_s10 }
   0x3   :  { %s180_s12 = smov 8  }
   0x4   :  { %20 = dma.hbm_to_vmem [thread:$0]  %s13_s8, 896, %s15_s10, [#allocation3], %s179_s11, %s179_s11, %s180_s12  }
   0x5   :  { %174 = dma.done.wait [#allocation3], 896  }
   0x6   :  { %175 = vsyncadd [#allocation3], 4294966400  ;;  %v35_v0 = vld [vmem:[#allocation2 + $0x28] sm:$0xff]  ;;  %v33_v3 = vld [vmem:[#allocation2 + $0x20] sm:$0xff]  ;;  %s181_s0 = smov [#allocation5]   ;;  %s107_s16 = sshll.u32 %s205_s1, 4  ;;  %s108_s16 = int_to_ptr.hbm [resolvable:$true] %s107_s16 }
   0x7   :  { %v27_v1 = vld [vmem:[#allocation2 + $0x8] sm:$0xff]  ;;  %v38_v2 = vmul.f32 1.9230769, %v35_v0  ;;  %v60_v5 = vsub.f32 1.0, %v33_v3  ;;  %v29_v7 = vld [vmem:[#allocation2 + $0x10] sm:$0xff]  ;;  %v63_v8 = vsub.f32 4.0, %v35_v0 }
   0x8   :  { %v59_v4 = vmul.f32 6.0, %v27_v1  ;;  %v67_v6 = vmul.f32 12.0, %v27_v1  ;;  %v31_v9 = vld [vmem:[#allocation2 + $0x18] sm:$0xff]  ;;  %v37_v10 = vld [vmem:[#allocation2 + $0x30] sm:$0xff]  ;;  %v62_v12 = vmul.f32 16.0, %v29_v7  ;;  %v25_v30 = vld [vmem:[#allocation2] sm:$0xff] }
   0x9   :  { %v39_v11 = vmul.f32 %v38_v2, %v38_v2  ;;  %v65_v14 = vmul.f32 100.0, %v31_v9  ;;  %v69_v15 = vsub.f32 %v31_v9, %v37_v10  ;;  %v86_v21 = vmul.f32 1.8, %v37_v10  ;;  %s105_s13 = sshll.u32 %s181_s0, 4  ;;  %s106_s13 = int_to_ptr.vmem [resolvable:$true] %s105_s13 }
   0xa   :  { %v61_v13 = vmul.f32 %v60_v5, %v59_v4  ;;  %v64_v17 = vmul.f32 %v63_v8, %v62_v12  ;;  %v68_v18 = vmul.f32 %v67_v6, %v33_v3  ;;  %v56_v34 = vmul.f32 100.0, %v25_v30 }
   0xb   :  { %v40_v16 = vmul.f32 %v39_v11, %v39_v11  ;;  %v66_v19 = vmul.f32 %v65_v14, %v33_v3  ;;  %v70_v20 = vmul.f32 13.0, %v69_v15  ;;  %v83_v48 = vmul.f32 1.28, %v35_v0 }
   0xc   :  { %v75_v23 = vsub.f32 %v61_v13, %v64_v17  ;;  %v57_v40 = vmul.f32 %v56_v34, %v35_v0  ;;  %v81_v44 = vmul.f32 2.0, %v64_v17 }
   0xd   :  { %v41_v22 = vadd.f32 1.0, %v40_v16  ;;  %v76_v24 = vsub.f32 %v64_v17, %v66_v19  ;;  %v78_v25 = vsub.f32 %v61_v13, %v66_v19  ;;  %v85_v26 = vmul.f32 0.1, %v70_v20 }
   0xe   :  { %92 = vst [vmem:[#allocation5 + $0x10] sm:$0xff] %v75_v23 }
   0xf   :  { %124 = vrcp.f32 %v41_v22  ;;  %v77_v27 = vsub.f32 %v76_v24, %v70_v20  ;;  %v79_v28 = vsub.f32 %v78_v25, %v68_v18  ;;  %v87_v29 = vsub.f32 %v85_v26, %v86_v21 }
  0x10   :  { %v53_v33 = vand.u32 2147483648, %v41_v22  ;;  %vm47_vm0 = vweird.f32 %v41_v22  ;;  %v51_v36 = vand.u32 2147483647, %v41_v22 }
  0x11   :  { %94 = vst [vmem:[#allocation5 + $0x18] sm:$0xff] %v77_v27 }
  0x12   :  { %96 = vst [vmem:[#allocation5 + $0x20] sm:$0xff] %v79_v28  ;;  %v54_v38 = vor.u32 1.1754944e-38, %v53_v33  ;;  %vm52_vm3 = vcmp.eq.f32.partialorder %v51_v36, 8.507059e+37 }
  0x13   :  { %100 = vst [vmem:[#allocation5 + $0x30] sm:$0xff] %v87_v29 }
  0x15   :  { %v125_v31 = vpop.eup %124 }
  0x16   :  { %v43_v32 = vmul.f32 %v125_v31, %v41_v22  ;;  %vm48_vm1 = vweird.f32 %v125_v31 }
  0x17   :  { %vm49_vm2 = vmor %vm47_vm0, %vm48_vm1 }
  0x18   :  { %v44_v35 = vsub.f32 1.0, %v43_v32 }
  0x1a   :  { %v45_v37 = vmul.f32 %v125_v31, %v44_v35 }
  0x1c   :  { %v46_v39 = vadd.f32 %v125_v31, %v45_v37 }
  0x1e   :  { %v50_v41 = vsel %vm49_vm2, %v125_v31, %v46_v39 }
  0x1f   :  { %v55_v42 = vsel %vm52_vm3, %v54_v38, %v50_v41 }
  0x20   :  { %v58_v43 = vmul.f32 %v57_v40, %v55_v42 }
  0x22   :  { %v71_v45 = vsub.f32 2.5, %v58_v43  ;;  %v72_v46 = vmul.f32 2.0, %v58_v43  ;;  %v80_v47 = vmul.f32 -2.0, %v58_v43 }
  0x24   :  { %88 = vst [vmem:[#allocation5] sm:$0xff] %v71_v45  ;;  %v73_v49 = vsub.f32 %v72_v46, %v61_v13  ;;  %v82_v50 = vadd.f32 %v81_v44, %v80_v47 }
  0x26   :  { %v74_v51 = vsub.f32 %v73_v49, %v68_v18  ;;  %v84_v52 = vsub.f32 %v82_v50, %v83_v48 }
  0x28   :  { %90 = vst [vmem:[#allocation5 + $0x8] sm:$0xff] %v74_v51 }
  0x29   :  { %98 = vst [vmem:[#allocation5 + $0x28] sm:$0xff] %v84_v52 }
  0x2a   :  { %113 = dma.vmem_to_hbm [thread:$0]  %s106_s13, 896, %s108_s16, [#allocation4], %s179_s11, %s179_s11, %s180_s12  }
  0x2b   :  { %176 = dma.done.wait [#allocation4], 896  }
  0x2c   :  { %177 = vsyncadd [#allocation4], 4294966400 }
  0x2d   :  { %118 = vsyncpa [#allocation3], 1 }
  0x2e   :  { %119 = vsyncpa [#allocation4], 1 }

</bundles_post_ra>
